<compile_context>
chip_gen: v7x
topology: tpu7x:2x2x1
jax: 0.10.0
libtpu: 0.0.40
codegen_flags: <defaults>
</compile_context>

<pallas_src>
import functools

import jax
import jax.numpy as jnp
from jax.experimental import pallas as pl
from jax.experimental.pallas import tpu as pltpu

NUM_ACTIONS = 12
LATENT_DIM = 32
BATCH = 4

_LANE = 128      # lane width (last dim)
_SUBLANE = 8     # sublane width (second-to-last dim)


def _round_up(x, m):
    return (x + m - 1) // m * m


def _gather_rows(ids_ref, emb_ref, out_ref, *, num_actions):
    """Fusion-ready gather body: out_ref[b, :] = emb_ref[ids_ref[b], :].

    ids_ref: SMEM (B_pad,)          int32 action ids
    emb_ref: VMEM (NA_pad, D_pad)   f32 lane-dense padded embedding table
    out_ref: VMEM (B_pad, D_pad)    f32 gathered rows (zero row if id invalid)

    Intended to be inlined into the kernel that consumes the embeddings; here
    it is wrapped in a standalone pallas_call only for the unit test below.
    """
    na_pad = emb_ref.shape[0]
    b_pad = out_ref.shape[0]
    for b in range(b_pad):                              # static unroll (B_pad small)
        idx = ids_ref[b]                                # scalar SMEM read (int32)
        valid = (idx >= 0) & (idx < num_actions)
        safe = jnp.clip(idx, 0, na_pad - 1)             # never address out of VMEM
        row = emb_ref[pl.ds(safe, 1), :]                # dynamic 1-sublane vector load
        out_ref[pl.ds(b, 1), :] = jnp.where(
            valid, row, jnp.zeros_like(row)
        ).astype(out_ref.dtype)


def embed_action_kernel(ids_ref, emb_ref, out_ref, *, num_actions):
    _gather_rows(ids_ref, emb_ref, out_ref, num_actions=num_actions)


def prepare_table(emb):
    """One-time (init-time) layout prep: sublane-align rows, pad latent dim to
    a full 128-lane multiple so every kernel store is a full unmasked vst.
    Kept in f32 to preserve the module's parameter precision exactly."""
    na, d = emb.shape
    na_pad = _round_up(na, _SUBLANE)
    d_pad = _round_up(d, _LANE)
    return jnp.pad(emb.astype(jnp.float32), ((0, na_pad - na), (0, d_pad - d)))


def embed_action_padded(inp, emb_padded, num_actions):
    """Preferred interface: returns the lane-dense (B_pad, D_pad) embeddings
    that a downstream kernel should consume directly (no lane-sparse slice)."""
    b = inp.shape[0]
    b_pad = _round_up(b, _SUBLANE)
    d_pad = emb_padded.shape[1]

    # Equivalent of `input[:, 0].to(torch.long)`: truncating cast, done in the
    # jitted wrapper so the kernel receives clean int32 scalars in SMEM.
    ids = inp[:, 0].astype(jnp.int32)
    ids = jnp.pad(ids, (0, b_pad - b))                  # sublane-pad the batch

    return pl.pallas_call(
        functools.partial(embed_action_kernel, num_actions=num_actions),
        out_shape=jax.ShapeDtypeStruct((b_pad, d_pad), emb_padded.dtype),
        in_specs=[
            pl.BlockSpec(memory_space=pltpu.MemorySpace.SMEM),   # int32 ids
            pl.BlockSpec(memory_space=pltpu.MemorySpace.VMEM),   # padded table
        ],
        out_specs=pl.BlockSpec(memory_space=pltpu.MemorySpace.VMEM),
    )(ids, emb_padded)


@functools.partial(jax.jit, static_argnames=("num_actions", "latent_dim"))
def embed_action(inp, emb_padded, num_actions, latent_dim):
    """Module-equivalent forward: (B, 1) float ids -> (B, latent_dim)."""
    out = embed_action_padded(inp, emb_padded, num_actions)
    # Slice only to match the PyTorch forward contract; real consumers should
    # take the padded output from embed_action_padded instead (perf review).
    return out[: inp.shape[0], :latent_dim]


if __name__ == "__main__":
    key = jax.random.PRNGKey(0)
    k_emb, k_idx = jax.random.split(key)

    # Deterministic "parameter" init (shape from __init__: (num_actions, latent_dim)).
    action_embedding = jax.random.normal(
        k_emb, (NUM_ACTIONS, LATENT_DIM), dtype=jnp.float32
    )
    emb_padded = prepare_table(action_embedding)  # done once, like parameter init

    # Input like the torch module expects: (batch, 1) with action ids stored
    # as float, cast to long inside forward.
    idx = jax.random.randint(k_idx, (BATCH, 1), 0, NUM_ACTIONS, dtype=jnp.int32)
    inp = idx.astype(jnp.float32)

    out = embed_action(inp, emb_padded, NUM_ACTIONS, LATENT_DIM)
    out = jax.block_until_ready(out)

    # Reference check against plain JAX gather.
    ref = action_embedding[idx[:, 0]]
    assert out.shape == (BATCH, LATENT_DIM)
    assert out.dtype == jnp.float32
    assert jnp.allclose(out, ref)

    print("KERNEL_OK")
</pallas_src>

<mosaic_0001>
module attributes {stable_mosaic.version = 11 : i64} {
  func.func @embed_action_kernel(%arg0: memref<8xi32, #tpu.memory_space<smem>>, %arg1: memref<16x128xf32, #tpu.memory_space<vmem>>, %arg2: memref<8x128xf32, #tpu.memory_space<vmem>>) attributes {dimension_semantics = [], scalar_prefetch = 0 : i64, scratch_operands = 0 : i64, tpu.core_type = #tpu.core_type<tc>} {
    %c0 = arith.constant 0 : index
    %0 = memref.load %arg0[%c0] : memref<8xi32, #tpu.memory_space<smem>>
    %c0_i32 = arith.constant 0 : i32
    %1 = arith.cmpi sge, %0, %c0_i32 : i32
    %c12_i32 = arith.constant 12 : i32
    %2 = arith.cmpi slt, %0, %c12_i32 : i32
    %3 = arith.andi %1, %2 : i1
    %c0_i32_0 = arith.constant 0 : i32
    %c15_i32 = arith.constant 15 : i32
    %4 = arith.maxsi %c0_i32_0, %0 : i32
    %5 = arith.minsi %c15_i32, %4 : i32
    %6 = arith.index_cast %5 : i32 to index
    %c0_1 = arith.constant 0 : index
    %7 = vector.load %arg1[%6, %c0_1] : memref<16x128xf32, #tpu.memory_space<vmem>>, vector<1x128xf32>
    %cst = arith.constant 0.000000e+00 : f32
    %8 = vector.broadcast %cst : f32 to vector<1x128xf32>
    %9 = arith.select %3, %7, %8 : vector<1x128xf32>
    %c0_2 = arith.constant 0 : index
    %c0_3 = arith.constant 0 : index
    %10 = vector.load %arg2[%c0_2, %c0_3] : memref<8x128xf32, #tpu.memory_space<vmem>>, vector<1x128xf32>
    tpu.vector_store %arg2[%c0_2, %c0_3], %9 {strides = array<i32>} : memref<8x128xf32, #tpu.memory_space<vmem>>, vector<1x128xf32>,
    %c1 = arith.constant 1 : index
    %11 = memref.load %arg0[%c1] : memref<8xi32, #tpu.memory_space<smem>>
    %c0_i32_4 = arith.constant 0 : i32
    %12 = arith.cmpi sge, %11, %c0_i32_4 : i32
    %c12_i32_5 = arith.constant 12 : i32
    %13 = arith.cmpi slt, %11, %c12_i32_5 : i32
    %14 = arith.andi %12, %13 : i1
    %c0_i32_6 = arith.constant 0 : i32
    %c15_i32_7 = arith.constant 15 : i32
    %15 = arith.maxsi %c0_i32_6, %11 : i32
    %16 = arith.minsi %c15_i32_7, %15 : i32
    %17 = arith.index_cast %16 : i32 to index
    %c0_8 = arith.constant 0 : index
    %18 = vector.load %arg1[%17, %c0_8] : memref<16x128xf32, #tpu.memory_space<vmem>>, vector<1x128xf32>
    %cst_9 = arith.constant 0.000000e+00 : f32
    %19 = vector.broadcast %cst_9 : f32 to vector<1x128xf32>
    %20 = arith.select %14, %18, %19 : vector<1x128xf32>
    %c1_10 = arith.constant 1 : index
    %c0_11 = arith.constant 0 : index
    %21 = vector.load %arg2[%c1_10, %c0_11] : memref<8x128xf32, #tpu.memory_space<vmem>>, vector<1x128xf32>
    tpu.vector_store %arg2[%c1_10, %c0_11], %20 {strides = array<i32>} : memref<8x128xf32, #tpu.memory_space<vmem>>, vector<1x128xf32>,
    %c2 = arith.constant 2 : index
    %22 = memref.load %arg0[%c2] : memref<8xi32, #tpu.memory_space<smem>>
    %c0_i32_12 = arith.constant 0 : i32
    %23 = arith.cmpi sge, %22, %c0_i32_12 : i32
    %c12_i32_13 = arith.constant 12 : i32
    %24 = arith.cmpi slt, %22, %c12_i32_13 : i32
    %25 = arith.andi %23, %24 : i1
    %c0_i32_14 = arith.constant 0 : i32
    %c15_i32_15 = arith.constant 15 : i32
    %26 = arith.maxsi %c0_i32_14, %22 : i32
    %27 = arith.minsi %c15_i32_15, %26 : i32
    %28 = arith.index_cast %27 : i32 to index
    %c0_16 = arith.constant 0 : index
    %29 = vector.load %arg1[%28, %c0_16] : memref<16x128xf32, #tpu.memory_space<vmem>>, vector<1x128xf32>
    %cst_17 = arith.constant 0.000000e+00 : f32
    %30 = vector.broadcast %cst_17 : f32 to vector<1x128xf32>
    %31 = arith.select %25, %29, %30 : vector<1x128xf32>
    %c2_18 = arith.constant 2 : index
    %c0_19 = arith.constant 0 : index
    %32 = vector.load %arg2[%c2_18, %c0_19] : memref<8x128xf32, #tpu.memory_space<vmem>>, vector<1x128xf32>
    tpu.vector_store %arg2[%c2_18, %c0_19], %31 {strides = array<i32>} : memref<8x128xf32, #tpu.memory_space<vmem>>, vector<1x128xf32>,
    %c3 = arith.constant 3 : index
    %33 = memref.load %arg0[%c3] : memref<8xi32, #tpu.memory_space<smem>>
    %c0_i32_20 = arith.constant 0 : i32
    %34 = arith.cmpi sge, %33, %c0_i32_20 : i32
    %c12_i32_21 = arith.constant 12 : i32
    %35 = arith.cmpi slt, %33, %c12_i32_21 : i32
    %36 = arith.andi %34, %35 : i1
    %c0_i32_22 = arith.constant 0 : i32
    %c15_i32_23 = arith.constant 15 : i32
    %37 = arith.maxsi %c0_i32_22, %33 : i32
    %38 = arith.minsi %c15_i32_23, %37 : i32
    %39 = arith.index_cast %38 : i32 to index
    %c0_24 = arith.constant 0 : index
    %40 = vector.load %arg1[%39, %c0_24] : memref<16x128xf32, #tpu.memory_space<vmem>>, vector<1x128xf32>
    %cst_25 = arith.constant 0.000000e+00 : f32
    %41 = vector.broadcast %cst_25 : f32 to vector<1x128xf32>
    %42 = arith.select %36, %40, %41 : vector<1x128xf32>
    %c3_26 = arith.constant 3 : index
    %c0_27 = arith.constant 0 : index
    %43 = vector.load %arg2[%c3_26, %c0_27] : memref<8x128xf32, #tpu.memory_space<vmem>>, vector<1x128xf32>
    tpu.vector_store %arg2[%c3_26, %c0_27], %42 {strides = array<i32>} : memref<8x128xf32, #tpu.memory_space<vmem>>, vector<1x128xf32>,
    %c4 = arith.constant 4 : index
    %44 = memref.load %arg0[%c4] : memref<8xi32, #tpu.memory_space<smem>>
    %c0_i32_28 = arith.constant 0 : i32
    %45 = arith.cmpi sge, %44, %c0_i32_28 : i32
    %c12_i32_29 = arith.constant 12 : i32
    %46 = arith.cmpi slt, %44, %c12_i32_29 : i32
    %47 = arith.andi %45, %46 : i1
    %c0_i32_30 = arith.constant 0 : i32
    %c15_i32_31 = arith.constant 15 : i32
    %48 = arith.maxsi %c0_i32_30, %44 : i32
    %49 = arith.minsi %c15_i32_31, %48 : i32
    %50 = arith.index_cast %49 : i32 to index
    %c0_32 = arith.constant 0 : index
    %51 = vector.load %arg1[%50, %c0_32] : memref<16x128xf32, #tpu.memory_space<vmem>>, vector<1x128xf32>
    %cst_33 = arith.constant 0.000000e+00 : f32
    %52 = vector.broadcast %cst_33 : f32 to vector<1x128xf32>
    %53 = arith.select %47, %51, %52 : vector<1x128xf32>
    %c4_34 = arith.constant 4 : index
    %c0_35 = arith.constant 0 : index
    %54 = vector.load %arg2[%c4_34, %c0_35] : memref<8x128xf32, #tpu.memory_space<vmem>>, vector<1x128xf32>
    tpu.vector_store %arg2[%c4_34, %c0_35], %53 {strides = array<i32>} : memref<8x128xf32, #tpu.memory_space<vmem>>, vector<1x128xf32>,
    %c5 = arith.constant 5 : index
    %55 = memref.load %arg0[%c5] : memref<8xi32, #tpu.memory_space<smem>>
    %c0_i32_36 = arith.constant 0 : i32
    %56 = arith.cmpi sge, %55, %c0_i32_36 : i32
    %c12_i32_37 = arith.constant 12 : i32
    %57 = arith.cmpi slt, %55, %c12_i32_37 : i32
    %58 = arith.andi %56, %57 : i1
    %c0_i32_38 = arith.constant 0 : i32
    %c15_i32_39 = arith.constant 15 : i32
    %59 = arith.maxsi %c0_i32_38, %55 : i32
    %60 = arith.minsi %c15_i32_39, %59 : i32
    %61 = arith.index_cast %60 : i32 to index
    %c0_40 = arith.constant 0 : index
    %62 = vector.load %arg1[%61, %c0_40] : memref<16x128xf32, #tpu.memory_space<vmem>>, vector<1x128xf32>
    %cst_41 = arith.constant 0.000000e+00 : f32
    %63 = vector.broadcast %cst_41 : f32 to vector<1x128xf32>
    %64 = arith.select %58, %62, %63 : vector<1x128xf32>
    %c5_42 = arith.constant 5 : index
    %c0_43 = arith.constant 0 : index
    %65 = vector.load %arg2[%c5_42, %c0_43] : memref<8x128xf32, #tpu.memory_space<vmem>>, vector<1x128xf32>
    tpu.vector_store %arg2[%c5_42, %c0_43], %64 {strides = array<i32>} : memref<8x128xf32, #tpu.memory_space<vmem>>, vector<1x128xf32>,
    %c6 = arith.constant 6 : index
    %66 = memref.load %arg0[%c6] : memref<8xi32, #tpu.memory_space<smem>>
    %c0_i32_44 = arith.constant 0 : i32
    %67 = arith.cmpi sge, %66, %c0_i32_44 : i32
    %c12_i32_45 = arith.constant 12 : i32
    %68 = arith.cmpi slt, %66, %c12_i32_45 : i32
    %69 = arith.andi %67, %68 : i1
    %c0_i32_46 = arith.constant 0 : i32
    %c15_i32_47 = arith.constant 15 : i32
    %70 = arith.maxsi %c0_i32_46, %66 : i32
    %71 = arith.minsi %c15_i32_47, %70 : i32
    %72 = arith.index_cast %71 : i32 to index
    %c0_48 = arith.constant 0 : index
    %73 = vector.load %arg1[%72, %c0_48] : memref<16x128xf32, #tpu.memory_space<vmem>>, vector<1x128xf32>
    %cst_49 = arith.constant 0.000000e+00 : f32
    %74 = vector.broadcast %cst_49 : f32 to vector<1x128xf32>
    %75 = arith.select %69, %73, %74 : vector<1x128xf32>
    %c6_50 = arith.constant 6 : index
    %c0_51 = arith.constant 0 : index
    %76 = vector.load %arg2[%c6_50, %c0_51] : memref<8x128xf32, #tpu.memory_space<vmem>>, vector<1x128xf32>
    tpu.vector_store %arg2[%c6_50, %c0_51], %75 {strides = array<i32>} : memref<8x128xf32, #tpu.memory_space<vmem>>, vector<1x128xf32>,
    %c7 = arith.constant 7 : index
    %77 = memref.load %arg0[%c7] : memref<8xi32, #tpu.memory_space<smem>>
    %c0_i32_52 = arith.constant 0 : i32
    %78 = arith.cmpi sge, %77, %c0_i32_52 : i32
    %c12_i32_53 = arith.constant 12 : i32
    %79 = arith.cmpi slt, %77, %c12_i32_53 : i32
    %80 = arith.andi %78, %79 : i1
    %c0_i32_54 = arith.constant 0 : i32
    %c15_i32_55 = arith.constant 15 : i32
    %81 = arith.maxsi %c0_i32_54, %77 : i32
    %82 = arith.minsi %c15_i32_55, %81 : i32
    %83 = arith.index_cast %82 : i32 to index
    %c0_56 = arith.constant 0 : index
    %84 = vector.load %arg1[%83, %c0_56] : memref<16x128xf32, #tpu.memory_space<vmem>>, vector<1x128xf32>
    %cst_57 = arith.constant 0.000000e+00 : f32
    %85 = vector.broadcast %cst_57 : f32 to vector<1x128xf32>
    %86 = arith.select %80, %84, %85 : vector<1x128xf32>
    %c7_58 = arith.constant 7 : index
    %c0_59 = arith.constant 0 : index
    %87 = vector.load %arg2[%c7_58, %c0_59] : memref<8x128xf32, #tpu.memory_space<vmem>>, vector<1x128xf32>
    tpu.vector_store %arg2[%c7_58, %c0_59], %86 {strides = array<i32>} : memref<8x128xf32, #tpu.memory_space<vmem>>, vector<1x128xf32>,
    return
  }
}

</mosaic_0001>

<bundles_post_ra>
// kernel: embed_action.1
= control target key start
LH: loop header
LB: loop body
LE: loop exit
PB: predicated region body
PF: predicated region fallthrough
CT: control target
= control target key end

     0   :  { %7 = vsyncpa [#allocation4], 0  ;;  %s412_s0 = inlined_call_operand.vmem [shape: s32[8], index: 0, kind: input, shape index: {}]   ;;  %s413_s1 = inlined_call_operand.hbm [shape: f32[16,128], index: 1, kind: input, shape index: {}]   ;;  %s414_s2 = inlined_call_operand.vmem [shape: f32[8,128], index: 2, kind: output, shape index: {}]  }
   0x1   :  { %s15_s11 = sshll.u32 %s412_s0, 4  ;;  %s16_s11 = int_to_ptr.vmem [resolvable:$true] %s15_s11 }
   0x2   :  { %8 = vsyncpa [#allocation3], 0  ;;  %s255_s12 = scalar_lea.vmem %s16_s11, 16  ;;  %p260_p1 = scmp.lt.s32.totalorder %s16_s11, %s16_s11 }
   0x3   :  { %p256_p0 = scmp.ne.s32.totalorder %s16_s11, %s255_s12  ;;  %p261_p2 = scmp.lt.s32.totalorder %s255_s12, %s255_s12 }
   0x5   :  { %p262_p3 = por %p261_p2, %p260_p1 }
   0x7   :  { %p263_p4 = pnand %p262_p3, %p256_p0 }
   0x9   :  { %266 = shalt.err (!%p263_p4)
}
   0xa   :  { %s293_s13 = smov [#allocation2]   ;;  %s294_s14 = smov [#allocation5]  }
   0xb   :  { %18 = dma.vmem_to_smem %s16_s11, 16, %s293_s13, [#allocation4]  }
   0xc   :  { %s24_s15 = sshll.u32 %s294_s14, 4  ;;  %s267_s18 = scalar_lea.hbm %s413_s1, 256  ;;  %s25_s15 = int_to_ptr.vmem [resolvable:$true] %s24_s15 }
   0xd   :  { %p268_p5 = scmp.ne.s32.totalorder %s413_s1, %s267_s18  ;;  %p271_p6 = scmp.lt.u32.totalorder %s267_s18, %s413_s1 }
   0xf   :  { %p273_p7 = pnand %p271_p6, %p268_p5 }
  0x11   :  { %276 = shalt.err (!%p273_p7)
}
  0x12   :  { %s277_s22 = scalar_lea.vmem %s25_s15, 256  ;;  %p282_p9 = scmp.lt.s32.totalorder %s25_s15, %s25_s15 }
  0x13   :  { %p278_p8 = scmp.ne.s32.totalorder %s25_s15, %s277_s22  ;;  %p283_p10 = scmp.lt.s32.totalorder %s277_s22, %s277_s22 }
  0x15   :  { %p284_p11 = por %p283_p10, %p282_p9 }
  0x17   :  { %p285_p12 = pnand %p284_p11, %p278_p8 }
  0x19   :  { %288 = shalt.err (!%p285_p12)
}
  0x1a   :  { %s295_s23 = smov 128   ;;  %s296_s24 = smov 8  }
  0x1b   :  { %30 = dma.hbm_to_vmem [thread:$0]  %s413_s1, 256, %s25_s15, [#allocation3], %s295_s23, %s295_s23, %s296_s24  }
  0x1c   :  { %289 = dma.done.wait [#allocation4], 16  }
  0x1d   :  { %290 = vsyncadd [#allocation4], 4294967280 }
  0x1e   :  { %291 = dma.done.wait [#allocation3], 256  }
  0x1f   :  { %292 = vsyncadd [#allocation3], 4294967040 }
  0x20   :  { %37 = sfence }
  0x21   :  { %s38_s27 = sld [smem:[#allocation2]]  ;;  %s327_s28 = sld [smem:[#allocation2 + $0x1]] }
  0x22   :  { %s329_s29 = sld [smem:[#allocation2 + $0x2]]  ;;  %s331_s30 = sld [smem:[#allocation2 + $0x3]] }
  0x23   :  { %s333_s3 = sld [smem:[#allocation2 + $0x4]]  ;;  %s335_s4 = sld [smem:[#allocation2 + $0x5]] }
  0x24   :  { %s337_s1 = sld [smem:[#allocation2 + $0x6]]  ;;  %s339_s5 = sld [smem:[#allocation2 + $0x7]] }
  0x27   :  { %p39_p13 = scmp.ge.s32.totalorder %s38_s27, 0  ;;  %p40_p0 = scmp.lt.s32.totalorder %s38_s27, 12 }
  0x28   :  { %p43_p1 = scmp.gt.s32.totalorder %s38_s27, 0  ;;  %p180_p2 = scmp.lt.s32.totalorder %s38_s27, 15 }
  0x29   :  { %p41_p3 = pnand %p40_p0, %p39_p13  ;;  %p55_p4 = scmp.ge.s32.totalorder %s327_s28, 0 }
  0x2a   :  { %s416_s27 = smov (!%p43_p1, %s38_s27), 0  ;;  %p56_p5 = scmp.lt.s32.totalorder %s327_s28, 12 }
  0x2b   :  { %s185_s6 = scalar_select %p41_p3, 0, 1 }
  0x2c   :  { %s418_s27 = smov (!%p180_p2, %s416_s27), 15  ;;  %p59_p6 = scmp.gt.s32.totalorder %s327_s28, 0 }
  0x2d   :  { %v50_v0 = vstv %s185_s6  ;;  %p187_p7 = scmp.lt.s32.totalorder %s327_s28, 15  ;;  %s47_s7 = scalar_lea.vmem [#allocation5], %s418_s27 }
  0x2e   :  { %vm51_vm0 = vcmp.eq.s32.totalorder %v50_v0, 1  ;;  %v48_v1 = vld [vmem:[%s47_s7] sm:$0x1]  ;;  %p57_p8 = pnand %p56_p5, %p55_p4  ;;  %p71_p9 = scmp.ge.s32.totalorder %s329_s29, 0 }
  0x2f   :  { %v52_v2 = vsel %vm51_vm0, %v48_v1, 0.0  ;;  %s420_s28 = smov (!%p59_p6, %s327_s28), 0  ;;  %p72_p10 = scmp.lt.s32.totalorder %s329_s29, 12 }
  0x30   :  { %53 = vst [vmem:[%s414_s2] sm:$0x1] %v52_v2  ;;  %s192_s10 = scalar_select %p57_p8, 0, 1 }
  0x31   :  { %s422_s28 = smov (!%p187_p7, %s420_s28), 15  ;;  %p75_p11 = scmp.gt.s32.totalorder %s329_s29, 0 }
  0x32   :  { %v66_v3 = vstv %s192_s10  ;;  %p194_p12 = scmp.lt.s32.totalorder %s329_s29, 15  ;;  %s63_s11 = scalar_lea.vmem [#allocation5], %s422_s28 }
  0x33   :  { %vm67_vm1 = vcmp.eq.s32.totalorder %v66_v3, 1  ;;  %v64_v4 = vld [vmem:[%s63_s11] sm:$0x1]  ;;  %p73_p13 = pnand %p72_p10, %p71_p9  ;;  %p87_p0 = scmp.ge.s32.totalorder %s331_s30, 0 }
  0x34   :  { %v68_v5 = vsel %vm67_vm1, %v64_v4, 0.0  ;;  %s424_s29 = smov (!%p75_p11, %s329_s29), 0  ;;  %p88_p1 = scmp.lt.s32.totalorder %s331_s30, 12 }
  0x35   :  { %69 = vst [vmem:[%s414_s2 + $0x1] sm:$0x1] %v68_v5  ;;  %s199_s14 = scalar_select %p73_p13, 0, 1 }
  0x36   :  { %s426_s29 = smov (!%p194_p12, %s424_s29), 15  ;;  %p91_p2 = scmp.gt.s32.totalorder %s331_s30, 0 }
  0x37   :  { %v82_v6 = vstv %s199_s14  ;;  %p201_p3 = scmp.lt.s32.totalorder %s331_s30, 15  ;;  %s79_s15 = scalar_lea.vmem [#allocation5], %s426_s29 }
  0x38   :  { %vm83_vm2 = vcmp.eq.s32.totalorder %v82_v6, 1  ;;  %v80_v7 = vld [vmem:[%s79_s15] sm:$0x1]  ;;  %p89_p4 = pnand %p88_p1, %p87_p0  ;;  %p103_p5 = scmp.ge.s32.totalorder %s333_s3, 0 }
  0x39   :  { %v84_v8 = vsel %vm83_vm2, %v80_v7, 0.0  ;;  %s428_s30 = smov (!%p91_p2, %s331_s30), 0  ;;  %p104_p6 = scmp.lt.s32.totalorder %s333_s3, 12 }
  0x3a   :  { %85 = vst [vmem:[%s414_s2 + $0x2] sm:$0x1] %v84_v8  ;;  %s206_s18 = scalar_select %p89_p4, 0, 1 }
  0x3b   :  { %s430_s30 = smov (!%p201_p3, %s428_s30), 15  ;;  %p107_p7 = scmp.gt.s32.totalorder %s333_s3, 0 }
  0x3c   :  { %v98_v9 = vstv %s206_s18  ;;  %p208_p8 = scmp.lt.s32.totalorder %s333_s3, 15  ;;  %s95_s19 = scalar_lea.vmem [#allocation5], %s430_s30 }
  0x3d   :  { %vm99_vm3 = vcmp.eq.s32.totalorder %v98_v9, 1  ;;  %v96_v10 = vld [vmem:[%s95_s19] sm:$0x1]  ;;  %p105_p9 = pnand %p104_p6, %p103_p5  ;;  %p119_p10 = scmp.ge.s32.totalorder %s335_s4, 0 }
  0x3e   :  { %v100_v11 = vsel %vm99_vm3, %v96_v10, 0.0  ;;  %s432_s3 = smov (!%p107_p7, %s333_s3), 0  ;;  %p120_p11 = scmp.lt.s32.totalorder %s335_s4, 12 }
  0x3f   :  { %101 = vst [vmem:[%s414_s2 + $0x3] sm:$0x1] %v100_v11  ;;  %s213_s21 = scalar_select %p105_p9, 0, 1 }
  0x40   :  { %s434_s3 = smov (!%p208_p8, %s432_s3), 15  ;;  %p123_p12 = scmp.gt.s32.totalorder %s335_s4, 0 }
  0x41   :  { %v114_v12 = vstv %s213_s21  ;;  %p215_p13 = scmp.lt.s32.totalorder %s335_s4, 15  ;;  %s111_s22 = scalar_lea.vmem [#allocation5], %s434_s3 }
  0x42   :  { %vm115_vm4 = vcmp.eq.s32.totalorder %v114_v12, 1  ;;  %v112_v13 = vld [vmem:[%s111_s22] sm:$0x1]  ;;  %p121_p0 = pnand %p120_p11, %p119_p10  ;;  %p135_p1 = scmp.ge.s32.totalorder %s337_s1, 0 }
  0x43   :  { %v116_v14 = vsel %vm115_vm4, %v112_v13, 0.0  ;;  %s436_s4 = smov (!%p123_p12, %s335_s4), 0  ;;  %p136_p2 = scmp.lt.s32.totalorder %s337_s1, 12 }
  0x44   :  { %117 = vst [vmem:[%s414_s2 + $0x4] sm:$0x1] %v116_v14  ;;  %s220_s25 = scalar_select %p121_p0, 0, 1 }
  0x45   :  { %s438_s4 = smov (!%p215_p13, %s436_s4), 15  ;;  %p139_p3 = scmp.gt.s32.totalorder %s337_s1, 0 }
  0x46   :  { %v130_v15 = vstv %s220_s25  ;;  %p222_p4 = scmp.lt.s32.totalorder %s337_s1, 15  ;;  %s127_s26 = scalar_lea.vmem [#allocation5], %s438_s4 }
  0x47   :  { %vm131_vm5 = vcmp.eq.s32.totalorder %v130_v15, 1  ;;  %v128_v16 = vld [vmem:[%s127_s26] sm:$0x1]  ;;  %p137_p5 = pnand %p136_p2, %p135_p1  ;;  %p151_p6 = scmp.ge.s32.totalorder %s339_s5, 0 }
  0x48   :  { %v132_v17 = vsel %vm131_vm5, %v128_v16, 0.0  ;;  %s440_s1 = smov (!%p139_p3, %s337_s1), 0  ;;  %p152_p7 = scmp.lt.s32.totalorder %s339_s5, 12 }
  0x49   :  { %133 = vst [vmem:[%s414_s2 + $0x5] sm:$0x1] %v132_v17  ;;  %s227_s29 = scalar_select %p137_p5, 0, 1 }
  0x4a   :  { %s442_s1 = smov (!%p222_p4, %s440_s1), 15  ;;  %p155_p8 = scmp.gt.s32.totalorder %s339_s5, 0 }
  0x4b   :  { %v146_v18 = vstv %s227_s29  ;;  %p229_p9 = scmp.lt.s32.totalorder %s339_s5, 15  ;;  %s143_s30 = scalar_lea.vmem [#allocation5], %s442_s1 }
  0x4c   :  { %vm147_vm6 = vcmp.eq.s32.totalorder %v146_v18, 1  ;;  %v144_v19 = vld [vmem:[%s143_s30] sm:$0x1]  ;;  %p153_p10 = pnand %p152_p7, %p151_p6  ;;  %s444_s5 = smov (!%p155_p8, %s339_s5), 0 }
  0x4d   :  { %v148_v20 = vsel %vm147_vm6, %v144_v19, 0.0  ;;  %s446_s5 = smov (!%p229_p9, %s444_s5), 15 }
  0x4e   :  { %149 = vst [vmem:[%s414_s2 + $0x6] sm:$0x1] %v148_v20  ;;  %s234_s6 = scalar_select %p153_p10, 0, 1 }
  0x4f   :  { %s159_s7 = scalar_lea.vmem [#allocation5], %s446_s5 }
  0x50   :  { %v162_v21 = vstv %s234_s6  ;;  %v160_v22 = vld [vmem:[%s159_s7] sm:$0x1] }
  0x51   :  { %vm163_vm7 = vcmp.eq.s32.totalorder %v162_v21, 1 }
  0x52   :  { %v164_v23 = vsel %vm163_vm7, %v160_v22, 0.0 }
  0x53   :  { %165 = vst [vmem:[%s414_s2 + $0x7] sm:$0x1] %v164_v23 }
  0x54   :  { %170 = vsyncpa [#allocation3], 1 }
  0x55   :  { %171 = vsyncpa [#allocation4], 1 }

</bundles_post_ra>
